<compile_context>
chip_gen: v5e
topology: v5e:2x2
jax: 0.10.0
libtpu: 0.0.40
codegen_flags: <defaults>
</compile_context>

<pallas_src>
import functools

import jax
import jax.numpy as jnp
from jax.experimental import pallas as pl
from jax.experimental.pallas import tpu as pltpu

_LANES = 128
_ACC_SUBLANES = 8
_DEFAULT_BLOCK_ROWS = 2048  # 2048 x 128 x 4B = 1 MiB per input per buffer


def _round_up(x, m):
    return ((x + m - 1) // m) * m


def _min_sublanes(dtype):
    # sub-32-bit dtypes pack along sublanes: bf16 -> 16 rows, int8/fp8 -> 32 rows
    return {4: 8, 2: 16, 1: 32}.get(jnp.dtype(dtype).itemsize, 8)


def _l1_partial_sum_kernel(x_ref, t_ref, out_ref, *,
                           block_rows, blocks_per_split, total_rows, needs_mask):
    """Accumulates per-split sum(|x - t|) into a (1, 8, 128) output block."""
    i = pl.program_id(1)  # reduction ("arbitrary") axis

    @pl.when(i == 0)
    def _():
        out_ref[...] = jnp.zeros_like(out_ref)

    absdiff = jnp.abs(x_ref[...].astype(jnp.float32)
                      - t_ref[...].astype(jnp.float32))

    if needs_mask:  # static: only emitted when the grid over-covers the array
        c = pl.program_id(0)
        row0 = (c * blocks_per_split + i) * block_rows
        local = jax.lax.broadcasted_iota(jnp.int32, absdiff.shape, 0)
        absdiff = jnp.where(row0 + local < total_rows, absdiff, 0.0)

    # Pure VPU vreg adds: fold (block_rows, 128) onto the (8, 128) accumulator.
    out_ref[...] += jnp.sum(
        absdiff.reshape(block_rows // _ACC_SUBLANES, _ACC_SUBLANES, _LANES),
        axis=0,
    )[None]


@jax.jit
def cycle_loss_forward(x, target, weight):
    """Returns (input_passthrough, loss) matching CycleLoss.forward semantics."""
    n_elems = x.size
    flat_x = x.reshape(-1)
    flat_t = target.reshape(-1)

    # Minimal lane pad only if numel is not a multiple of 128 (zeros contribute
    # |0-0| = 0 since BOTH tensors get the identical pad).
    padded_n = _round_up(n_elems, _LANES)
    if padded_n != n_elems:
        pad = padded_n - n_elems
        flat_x = jnp.pad(flat_x, (0, pad))
        flat_t = jnp.pad(flat_t, (0, pad))
    rows = padded_n // _LANES

    sub = _min_sublanes(x.dtype)
    block_rows = min(_DEFAULT_BLOCK_ROWS, _round_up(rows, sub))
    num_blocks = pl.cdiv(rows, block_rows)

    # Leading parallel axis: lets v7x megacore split the HBM streaming 2-way.
    n_split = 2 if num_blocks >= 2 else 1
    blocks_per_split = pl.cdiv(num_blocks, n_split)
    coverage_rows = n_split * blocks_per_split * block_rows
    needs_mask = coverage_rows != rows
    has_oob_blocks = n_split * blocks_per_split > num_blocks

    x2d = flat_x.reshape(rows, _LANES)
    t2d = flat_t.reshape(rows, _LANES)

    def in_index_map(c, i):
        blk = c * blocks_per_split + i
        if has_oob_blocks:
            # Clamp over-coverage block indices onto the last valid block; the
            # in-kernel row mask zeroes their contribution entirely.
            blk = jnp.minimum(blk, num_blocks - 1)
        return (blk, 0)

    kernel = functools.partial(
        _l1_partial_sum_kernel,
        block_rows=block_rows,
        blocks_per_split=blocks_per_split,
        total_rows=rows,
        needs_mask=needs_mask,
    )

    # Pipelined VMEM footprint: 2 inputs x 2 buffers x (block_rows*128*4B)
    # (= 4 MiB at the default block) + a 4 KiB output accumulator per split —
    # comfortably inside the scoped-VMEM defaults on v5e/v6e/v7x.
    partials = pl.pallas_call(
        kernel,
        out_shape=jax.ShapeDtypeStruct(
            (n_split, _ACC_SUBLANES, _LANES), jnp.float32),
        grid_spec=pltpu.PrefetchScalarGridSpec(
            num_scalar_prefetch=0,
            grid=(n_split, blocks_per_split),
            in_specs=[
                pl.BlockSpec((block_rows, _LANES), in_index_map),
                pl.BlockSpec((block_rows, _LANES), in_index_map),
            ],
            out_specs=pl.BlockSpec(
                (1, _ACC_SUBLANES, _LANES), lambda c, i: (c, 0, 0)),
        ),
        compiler_params=pltpu.CompilerParams(
            dimension_semantics=("parallel", "arbitrary"),
        ),
    )(x2d, t2d)

    abs_sum = jnp.sum(partials)  # tiny final cross-lane reduce, done once in XLA
    loss = abs_sum * (weight / jnp.float32(n_elems))
    # forward() returns the input unchanged (loss is a side value).
    return x, loss


if __name__ == "__main__":
    key = jax.random.PRNGKey(0)
    k1, k2 = jax.random.split(key)

    # Small NCHW shapes consistent with the module's image-style usage.
    x = jax.random.normal(k1, (2, 4, 16, 16), dtype=jnp.float32)
    target = jax.random.normal(k2, (2, 4, 16, 16), dtype=jnp.float32)
    weight = 0.5

    out, loss = cycle_loss_forward(x, target, weight)
    jax.block_until_ready((out, loss))

    # sanity check vs pure-JAX reference
    ref_loss = jnp.mean(jnp.abs(x - target)) * weight
    assert jnp.allclose(loss, ref_loss, rtol=1e-5, atol=1e-6), (loss, ref_loss)
    assert jnp.array_equal(out, x)

    print("KERNEL_OK")
</pallas_src>

<mosaic_0001>
module attributes {stable_mosaic.version = 11 : i64} {
  func.func @_l1_partial_sum_kernel(%arg0: i32, %arg1: i32, %arg2: memref<16x128xf32, #tpu.memory_space<vmem>>, %arg3: memref<16x128xf32, #tpu.memory_space<vmem>>, %arg4: memref<1x8x128xf32, #tpu.memory_space<vmem>>) attributes {dimension_semantics = [#tpu.dimension_semantics<parallel>, #tpu.dimension_semantics<arbitrary>], iteration_bounds = array<i64: 1, 1>, scalar_prefetch = 0 : i64, scratch_operands = 0 : i64, tpu.core_type = #tpu.core_type<tc>, window_params = [{transform_indices = @transform_0, window_bounds = array<i64: 16, 128>}, {transform_indices = @transform_1, window_bounds = array<i64: 16, 128>}, {transform_indices = @transform_2, window_bounds = array<i64: 1, 8, 128>}]} {
    %c0_i32 = arith.constant 0 : i32
    %0 = arith.cmpi eq, %arg1, %c0_i32 : i32
    %1 = arith.extui %0 : i1 to i32
    %c0_i32_0 = arith.constant 0 : i32
    %2 = arith.cmpi ne, %1, %c0_i32_0 : i32
    scf.if %2 {
      %cst_10 = arith.constant 0.000000e+00 : f32
      %13 = vector.broadcast %cst_10 : f32 to vector<1x8x128xf32>
      %c0_11 = arith.constant 0 : index
      %c0_12 = arith.constant 0 : index
      %c0_13 = arith.constant 0 : index
      %14 = vector.load %arg4[%c0_11, %c0_12, %c0_13] : memref<1x8x128xf32, #tpu.memory_space<vmem>>, vector<1x8x128xf32>
      tpu.vector_store %arg4[%c0_11, %c0_12, %c0_13], %13 {strides = array<i32>} : memref<1x8x128xf32, #tpu.memory_space<vmem>>, vector<1x8x128xf32>,
    } else {
    }
    %c0 = arith.constant 0 : index
    %c0_1 = arith.constant 0 : index
    %3 = vector.load %arg2[%c0, %c0_1] : memref<16x128xf32, #tpu.memory_space<vmem>>, vector<16x128xf32>
    %c0_2 = arith.constant 0 : index
    %c0_3 = arith.constant 0 : index
    %4 = vector.load %arg3[%c0_2, %c0_3] : memref<16x128xf32, #tpu.memory_space<vmem>>, vector<16x128xf32>
    %5 = arith.subf %3, %4 : vector<16x128xf32>
    %6 = math.absf %5 : vector<16x128xf32>
    %c0_4 = arith.constant 0 : index
    %c0_5 = arith.constant 0 : index
    %c0_6 = arith.constant 0 : index
    %7 = vector.load %arg4[%c0_4, %c0_5, %c0_6] : memref<1x8x128xf32, #tpu.memory_space<vmem>>, vector<1x8x128xf32>
    %8 = vector.shape_cast %6 : vector<16x128xf32> to vector<2x8x128xf32>
    %cst = arith.constant dense<0.000000e+00> : vector<8x128xf32>
    %9 = vector.multi_reduction <add>, %8, %cst [0] : vector<2x8x128xf32> to vector<8x128xf32>
    %10 = vector.shape_cast %9 : vector<8x128xf32> to vector<1x8x128xf32>
    %11 = arith.addf %7, %10 : vector<1x8x128xf32>
    %c0_7 = arith.constant 0 : index
    %c0_8 = arith.constant 0 : index
    %c0_9 = arith.constant 0 : index
    %12 = vector.load %arg4[%c0_7, %c0_8, %c0_9] : memref<1x8x128xf32, #tpu.memory_space<vmem>>, vector<1x8x128xf32>
    tpu.vector_store %arg4[%c0_7, %c0_8, %c0_9], %11 {strides = array<i32>} : memref<1x8x128xf32, #tpu.memory_space<vmem>>, vector<1x8x128xf32>,
    return
  }
  func.func @transform_0(%arg0: i32, %arg1: i32) -> (i32, i32) {
    %c1_i32 = arith.constant 1 : i32
    %0 = arith.muli %arg0, %c1_i32 : i32
    %1 = arith.addi %0, %arg1 : i32
    %c0_i32 = arith.constant 0 : i32
    %c0_i32_0 = arith.constant 0 : i32
    return %1, %c0_i32 : i32, i32
  }
  func.func @transform_1(%arg0: i32, %arg1: i32) -> (i32, i32) {
    %c1_i32 = arith.constant 1 : i32
    %0 = arith.muli %arg0, %c1_i32 : i32
    %1 = arith.addi %0, %arg1 : i32
    %c0_i32 = arith.constant 0 : i32
    %c0_i32_0 = arith.constant 0 : i32
    return %1, %c0_i32 : i32, i32
  }
  func.func @transform_2(%arg0: i32, %arg1: i32) -> (i32, i32, i32) {
    %c0_i32 = arith.constant 0 : i32
    %c0_i32_0 = arith.constant 0 : i32
    %c0_i32_1 = arith.constant 0 : i32
    return %arg0, %c0_i32, %c0_i32_0 : i32, i32, i32
  }
}

</mosaic_0001>

<bundles_post_ra>
// kernel: cycle_loss_forward.1
= control target key start
LH: loop header
LB: loop body
LE: loop exit
PB: predicated region body
PF: predicated region fallthrough
CT: control target
= control target key end

     0   :  { %s119_s0 = inlined_call_operand.vmem [shape: f32[16,128], index: 0, kind: input, shape index: {}]   ;;  %s120_s1 = inlined_call_operand.vmem [shape: f32[16,128], index: 1, kind: input, shape index: {}]   ;;  %s121_s2 = inlined_call_operand.vmem [shape: f32[1,8,128], index: 2, kind: output, shape index: {}]  }
   0x1   :  { %v60_v0 = vld [vmem:[%s119_s0] sm:$0xff]  ;;  %v61_v1 = vld [vmem:[%s119_s0 + $0x8] sm:$0xff] }
   0x2   :  { %v62_v2 = vld [vmem:[%s120_s1] sm:$0xff]  ;;  %v63_v3 = vld [vmem:[%s120_s1 + $0x8] sm:$0xff] }
   0x3   :  { %v64_v4 = vsub.f32 %v60_v0, %v62_v2  ;;  %v65_v5 = vsub.f32 %v61_v1, %v63_v3 }
   0x5   :  { %v66_v6 = vand.u32 2147483647, %v64_v4  ;;  %v67_v7 = vand.u32 2147483647, %v65_v5 }
   0x7   :  { %v69_v8 = vadd.f32 %v67_v7, %v66_v6 }
   0x9   :  { %71 = vst [vmem:[%s121_s2] sm:$0xff] %v69_v8 }

</bundles_post_ra>
